<compile_context>
chip_gen: v5e
topology: v5e:2x2
jax: 0.10.0
libtpu: 0.0.40
codegen_flags: <defaults>
</compile_context>

<pallas_src>
import jax
import jax.numpy as jnp
from jax.experimental import pallas as pl
from jax.experimental.pallas import tpu as pltpu


def resnet_block_kernel(x_ref, w1_ref, b1_ref, w2_ref, b2_ref, o_ref):
    # First Linear + ReLU: bf16 MXU matmul, f32 accumulation.
    h = jnp.dot(x_ref[...].astype(jnp.bfloat16), w1_ref[...],
                preferred_element_type=jnp.float32)
    h = jnp.maximum(h + b1_ref[...], 0.0)            # bias (1, Hp) broadcasts

    # Second Linear: bf16 operands, f32 accumulation.
    y = jnp.dot(h.astype(jnp.bfloat16), w2_ref[...],
                preferred_element_type=jnp.float32)
    y = y + b2_ref[...]

    # Residual: re-read x from the resident VMEM tile (cheap vld) rather than
    # keeping a (TB, Hp) f32 copy live across both matmuls.
    o_ref[...] = (y + x_ref[...].astype(jnp.float32)).astype(o_ref.dtype)


def _round_up(n, m):
    return ((n + m - 1) // m) * m


def _choose_tb(batch, block_b):
    """Row tile: multiple of 8, >= 2 grid steps, even step count when possible."""
    b8 = _round_up(max(batch, 8), 8)
    tb = min(_round_up(block_b, 8), _round_up(pl.cdiv(b8, 2), 8))
    tb = max(tb, 8)
    steps = pl.cdiv(b8, tb)
    if steps > 1 and steps % 2 == 1:
        # An odd step count leaves one v7x TensorCore an extra tile; rebalance.
        tb = max(8, _round_up(pl.cdiv(b8, steps + 1), 8))
    return tb


def _physical_vmem_bytes():
    try:
        return int(pltpu.get_tpu_info().vmem_capacity_bytes)
    except Exception:
        return 64 << 20      # conservative: v7x per-TensorCore VMEM


def resnet_forward(x, w1, b1, w2, b2, *, block_b=512):
    """Fused ResNet block: relu(x @ w1 + b1) @ w2 + b2 + x.

    w1, w2: (in_features, out_features) = (H, H).  b1, b2: (H,) or (1, H).
    """
    B, H = x.shape
    assert w1.shape == (H, H) and w2.shape == (H, H), "residual needs in == out"
    out_dtype = x.dtype

    # --- lane padding: H -> multiple of 128 (lane-dense stores, full MXU) ----
    Hp = _round_up(H, 128)
    dh = Hp - H

    # --- batch tiling: >= 2 grid steps, multiple of 8 sublane rows -----------
    tb = _choose_tb(B, block_b)
    b_pad = _round_up(B, tb)

    x_in = x
    if b_pad != B or dh != 0:
        x_in = jnp.pad(x, ((0, b_pad - B), (0, dh)))

    # --- stationary operands: bf16 weights, f32 biases (zero-padded) ---------
    if dh:
        w1b = jnp.pad(w1, ((0, dh), (0, dh))).astype(jnp.bfloat16)
        w2b = jnp.pad(w2, ((0, dh), (0, dh))).astype(jnp.bfloat16)
    else:
        w1b = w1.astype(jnp.bfloat16)
        w2b = w2.astype(jnp.bfloat16)
    b1f = jnp.pad(jnp.asarray(b1, jnp.float32).reshape(1, H), ((0, 0), (0, dh)))
    b2f = jnp.pad(jnp.asarray(b2, jnp.float32).reshape(1, H), ((0, 0), (0, dh)))

    grid = (b_pad // tb,)

    in_bytes = jnp.dtype(x.dtype).itemsize
    out_bytes = jnp.dtype(out_dtype).itemsize
    cost = pl.CostEstimate(
        flops=4 * b_pad * Hp * Hp,                          # two (TBxHp)@(HpxHp)
        transcendentals=0,
        bytes_accessed=(b_pad * Hp * (in_bytes + out_bytes)  # x in + out
                        + 2 * Hp * Hp * 2                    # bf16 weights
                        + 2 * Hp * 4),                       # f32 biases
    )

    # --- VMEM budget: double-buffered x/out tiles + stationary weights +
    #     f32 intermediates, capped at ~75% of physical VMEM ------------------
    vmem_needed = (2 * tb * Hp * in_bytes        # x tiles (double-buffered)
                   + 2 * tb * Hp * out_bytes     # out tiles (double-buffered)
                   + 2 * Hp * Hp * 2             # bf16 weights
                   + 2 * Hp * 4                  # biases
                   + 4 * tb * Hp * 4)            # f32 intermediates / headroom
    vmem_limit = int(min(max(2 * vmem_needed, 32 << 20),
                         (3 * _physical_vmem_bytes()) // 4))

    def _run(single_buffer_stationary):
        # Constant index_map => stationary operands are fetched once; Buffered(1)
        # drops the second (never-used) buffer, freeing ~4*Hp^2 bytes of VMEM.
        skw = ({"pipeline_mode": pl.Buffered(1)}
               if single_buffer_stationary else {})
        return pl.pallas_call(
            resnet_block_kernel,
            out_shape=jax.ShapeDtypeStruct((b_pad, Hp), out_dtype),
            grid=grid,
            in_specs=[
                pl.BlockSpec((tb, Hp), lambda i: (i, 0)),         # x: streamed
                pl.BlockSpec((Hp, Hp), lambda i: (0, 0), **skw),  # w1: stationary
                pl.BlockSpec((1, Hp), lambda i: (0, 0), **skw),   # b1: stationary
                pl.BlockSpec((Hp, Hp), lambda i: (0, 0), **skw),  # w2: stationary
                pl.BlockSpec((1, Hp), lambda i: (0, 0), **skw),   # b2: stationary
            ],
            out_specs=pl.BlockSpec((tb, Hp), lambda i: (i, 0)),
            compiler_params=pltpu.CompilerParams(
                dimension_semantics=("parallel",),   # megacore sharding on v7x
                vmem_limit_bytes=vmem_limit,
            ),
            cost_estimate=cost,
        )(x_in, w1b, b1f, w2b, b2f)

    try:
        out = _run(True)
    except Exception:
        # pl.Buffered(1) is only a VMEM-footprint optimization; fall back to the
        # default double-buffered stationary operands if unsupported.
        out = _run(False)

    if b_pad != B or dh != 0:
        out = out[:B, :H]
    return out


def reference_forward(x, w1, b1, w2, b2):
    # Pure-JAX reference with the same numerics (bf16 operands, f32 accum).
    h = jnp.dot(x.astype(jnp.bfloat16), w1.astype(jnp.bfloat16),
                preferred_element_type=jnp.float32)
    h = jnp.maximum(h + b1.reshape(1, -1), 0.0)
    y = jnp.dot(h.astype(jnp.bfloat16), w2.astype(jnp.bfloat16),
                preferred_element_type=jnp.float32)
    return y + b2.reshape(1, -1) + x


if __name__ == "__main__":
    # B not a multiple of the tile (exercises batch padding + a 2-step,
    # pipelined grid) and H not a multiple of 128 (exercises lane padding).
    B, H = 200, 96

    key = jax.random.PRNGKey(0)
    kx, kw1, kb1, kw2, kb2 = jax.random.split(key, 5)

    scale = 1.0 / jnp.sqrt(H)
    x = jax.random.normal(kx, (B, H), dtype=jnp.float32)
    w1 = jax.random.uniform(kw1, (H, H), jnp.float32, -scale, scale)
    b1 = jax.random.uniform(kb1, (1, H), jnp.float32, -scale, scale)
    w2 = jax.random.uniform(kw2, (H, H), jnp.float32, -scale, scale)
    b2 = jax.random.uniform(kb2, (1, H), jnp.float32, -scale, scale)

    out = resnet_forward(x, w1, b1, w2, b2)
    out = jax.block_until_ready(out)

    ref = reference_forward(x, w1, b1, w2, b2)
    assert out.shape == (B, H)
    assert jnp.allclose(out, ref, atol=1e-3, rtol=1e-3), "mismatch vs reference"

    print("KERNEL_OK")
</pallas_src>

<mosaic_0001>
module attributes {stable_mosaic.version = 11 : i64} {
  func.func @resnet_block_kernel(%arg0: i32, %arg1: memref<104x128xf32, #tpu.memory_space<vmem>>, %arg2: memref<128x128xbf16, #tpu.memory_space<vmem>>, %arg3: memref<1x128xf32, #tpu.memory_space<vmem>>, %arg4: memref<128x128xbf16, #tpu.memory_space<vmem>>, %arg5: memref<1x128xf32, #tpu.memory_space<vmem>>, %arg6: memref<104x128xf32, #tpu.memory_space<vmem>>) attributes {dimension_semantics = [#tpu.dimension_semantics<parallel>], iteration_bounds = array<i64: 2>, scalar_prefetch = 0 : i64, scratch_operands = 0 : i64, tpu.core_type = #tpu.core_type<tc>, window_params = [{transform_indices = @transform_0, window_bounds = array<i64: 104, 128>}, {pipeline_mode = #tpu.pipeline_mode<synchronous>, transform_indices = @transform_1, window_bounds = array<i64: 128, 128>}, {pipeline_mode = #tpu.pipeline_mode<synchronous>, transform_indices = @transform_2, window_bounds = array<i64: 1, 128>}, {pipeline_mode = #tpu.pipeline_mode<synchronous>, transform_indices = @transform_3, window_bounds = array<i64: 128, 128>}, {pipeline_mode = #tpu.pipeline_mode<synchronous>, transform_indices = @transform_4, window_bounds = array<i64: 1, 128>}, {transform_indices = @transform_5, window_bounds = array<i64: 104, 128>}]} {
    %c0 = arith.constant 0 : index
    %c0_0 = arith.constant 0 : index
    %0 = vector.load %arg1[%c0, %c0_0] : memref<104x128xf32, #tpu.memory_space<vmem>>, vector<104x128xf32>
    %1 = arith.truncf %0 : vector<104x128xf32> to vector<104x128xbf16>
    %c0_1 = arith.constant 0 : index
    %c0_2 = arith.constant 0 : index
    %2 = vector.load %arg2[%c0_1, %c0_2] : memref<128x128xbf16, #tpu.memory_space<vmem>>, vector<128x128xbf16>
    %cst = arith.constant dense<0.000000e+00> : vector<104x128xf32>
    %3 = tpu.matmul %1, %2, %cst {dimension_numbers = #tpu.dot_dimension_numbers<[1], [0], [0], [1], [0, 0, 1, 1], [], []>} : vector<104x128xbf16>, vector<128x128xbf16>, vector<104x128xf32> -> vector<104x128xf32>
    %c0_3 = arith.constant 0 : index
    %c0_4 = arith.constant 0 : index
    %4 = vector.load %arg3[%c0_3, %c0_4] : memref<1x128xf32, #tpu.memory_space<vmem>>, vector<1x128xf32>
    %5 = vector.broadcast %4 : vector<1x128xf32> to vector<104x128xf32>
    %6 = arith.addf %3, %5 : vector<104x128xf32>
    %cst_5 = arith.constant 0.000000e+00 : f32
    %7 = vector.broadcast %cst_5 : f32 to vector<104x128xf32>
    %8 = arith.maximumf %6, %7 : vector<104x128xf32>
    %9 = arith.truncf %8 : vector<104x128xf32> to vector<104x128xbf16>
    %c0_6 = arith.constant 0 : index
    %c0_7 = arith.constant 0 : index
    %10 = vector.load %arg4[%c0_6, %c0_7] : memref<128x128xbf16, #tpu.memory_space<vmem>>, vector<128x128xbf16>
    %cst_8 = arith.constant dense<0.000000e+00> : vector<104x128xf32>
    %11 = tpu.matmul %9, %10, %cst_8 {dimension_numbers = #tpu.dot_dimension_numbers<[1], [0], [0], [1], [0, 0, 1, 1], [], []>} : vector<104x128xbf16>, vector<128x128xbf16>, vector<104x128xf32> -> vector<104x128xf32>
    %c0_9 = arith.constant 0 : index
    %c0_10 = arith.constant 0 : index
    %12 = vector.load %arg5[%c0_9, %c0_10] : memref<1x128xf32, #tpu.memory_space<vmem>>, vector<1x128xf32>
    %13 = vector.broadcast %12 : vector<1x128xf32> to vector<104x128xf32>
    %14 = arith.addf %11, %13 : vector<104x128xf32>
    %c0_11 = arith.constant 0 : index
    %c0_12 = arith.constant 0 : index
    %15 = vector.load %arg1[%c0_11, %c0_12] : memref<104x128xf32, #tpu.memory_space<vmem>>, vector<104x128xf32>
    %16 = arith.addf %14, %15 : vector<104x128xf32>
    %c0_13 = arith.constant 0 : index
    %c0_14 = arith.constant 0 : index
    %17 = vector.load %arg6[%c0_13, %c0_14] : memref<104x128xf32, #tpu.memory_space<vmem>>, vector<104x128xf32>
    tpu.vector_store %arg6[%c0_13, %c0_14], %16 {strides = array<i32>} : memref<104x128xf32, #tpu.memory_space<vmem>>, vector<104x128xf32>,
    return
  }
  func.func @transform_0(%arg0: i32) -> (i32, i32) {
    %c0_i32 = arith.constant 0 : i32
    %c0_i32_0 = arith.constant 0 : i32
    return %arg0, %c0_i32 : i32, i32
  }
  func.func @transform_1(%arg0: i32) -> (i32, i32) {
    %c0_i32 = arith.constant 0 : i32
    %c0_i32_0 = arith.constant 0 : i32
    %c0_i32_1 = arith.constant 0 : i32
    return %c0_i32, %c0_i32_0 : i32, i32
  }
  func.func @transform_2(%arg0: i32) -> (i32, i32) {
    %c0_i32 = arith.constant 0 : i32
    %c0_i32_0 = arith.constant 0 : i32
    %c0_i32_1 = arith.constant 0 : i32
    return %c0_i32, %c0_i32_0 : i32, i32
  }
  func.func @transform_3(%arg0: i32) -> (i32, i32) {
    %c0_i32 = arith.constant 0 : i32
    %c0_i32_0 = arith.constant 0 : i32
    %c0_i32_1 = arith.constant 0 : i32
    return %c0_i32, %c0_i32_0 : i32, i32
  }
  func.func @transform_4(%arg0: i32) -> (i32, i32) {
    %c0_i32 = arith.constant 0 : i32
    %c0_i32_0 = arith.constant 0 : i32
    %c0_i32_1 = arith.constant 0 : i32
    return %c0_i32, %c0_i32_0 : i32, i32
  }
  func.func @transform_5(%arg0: i32) -> (i32, i32) {
    %c0_i32 = arith.constant 0 : i32
    %c0_i32_0 = arith.constant 0 : i32
    return %arg0, %c0_i32 : i32, i32
  }
}

module attributes {stable_mosaic.version = 11 : i64} {
  func.func @resnet_block_kernel(%arg0: i32, %arg1: memref<104x128xf32, #tpu.memory_space<vmem>>, %arg2: memref<128x128xbf16, #tpu.memory_space<vmem>>, %arg3: memref<1x128xf32, #tpu.memory_space<vmem>>, %arg4: memref<128x128xbf16, #tpu.memory_space<vmem>>, %arg5: memref<1x128xf32, #tpu.memory_space<vmem>>, %arg6: memref<104x128xf32, #tpu.memory_space<vmem>>) attributes {dimension_semantics = [#tpu.dimension_semantics<parallel>], iteration_bounds = array<i64: 2>, scalar_prefetch = 0 : i64, scratch_operands = 0 : i64, tpu.core_type = #tpu.core_type<tc>, window_params = [{transform_indices = @transform_0, window_bounds = array<i64: 104, 128>}, {pipeline_mode = #tpu.pipeline_mode<synchronous>, transform_indices = @transform_1, window_bounds = array<i64: 128, 128>}, {pipeline_mode = #tpu.pipeline_mode<synchronous>, transform_indices = @transform_2, window_bounds = array<i64: 1, 128>}, {pipeline_mode = #tpu.pipeline_mode<synchronous>, transform_indices = @transform_3, window_bounds = array<i64: 128, 128>}, {pipeline_mode = #tpu.pipeline_mode<synchronous>, transform_indices = @transform_4, window_bounds = array<i64: 1, 128>}, {transform_indices = @transform_5, window_bounds = array<i64: 104, 128>}]} {
    %c0 = arith.constant 0 : index
    %c0_0 = arith.constant 0 : index
    %0 = vector.load %arg1[%c0, %c0_0] : memref<104x128xf32, #tpu.memory_space<vmem>>, vector<104x128xf32>
    %1 = arith.truncf %0 : vector<104x128xf32> to vector<104x128xbf16>
    %c0_1 = arith.constant 0 : index
    %c0_2 = arith.constant 0 : index
    %2 = vector.load %arg2[%c0_1, %c0_2] : memref<128x128xbf16, #tpu.memory_space<vmem>>, vector<128x128xbf16>
    %cst = arith.constant dense<0.000000e+00> : vector<104x128xf32>
    %3 = tpu.matmul %1, %2, %cst {dimension_numbers = #tpu.dot_dimension_numbers<[1], [0], [0], [1], [0, 0, 1, 1], [], []>} : vector<104x128xbf16>, vector<128x128xbf16>, vector<104x128xf32> -> vector<104x128xf32>
    %c0_3 = arith.constant 0 : index
    %c0_4 = arith.constant 0 : index
    %4 = vector.load %arg3[%c0_3, %c0_4] : memref<1x128xf32, #tpu.memory_space<vmem>>, vector<1x128xf32>
    %5 = vector.broadcast %4 : vector<1x128xf32> to vector<104x128xf32>
    %6 = arith.addf %3, %5 : vector<104x128xf32>
    %cst_5 = arith.constant 0.000000e+00 : f32
    %7 = vector.broadcast %cst_5 : f32 to vector<104x128xf32>
    %8 = arith.maximumf %6, %7 : vector<104x128xf32>
    %9 = arith.truncf %8 : vector<104x128xf32> to vector<104x128xbf16>
    %c0_6 = arith.constant 0 : index
    %c0_7 = arith.constant 0 : index
    %10 = vector.load %arg4[%c0_6, %c0_7] : memref<128x128xbf16, #tpu.memory_space<vmem>>, vector<128x128xbf16>
    %cst_8 = arith.constant dense<0.000000e+00> : vector<104x128xf32>
    %11 = tpu.matmul %9, %10, %cst_8 {dimension_numbers = #tpu.dot_dimension_numbers<[1], [0], [0], [1], [0, 0, 1, 1], [], []>} : vector<104x128xbf16>, vector<128x128xbf16>, vector<104x128xf32> -> vector<104x128xf32>
    %c0_9 = arith.constant 0 : index
    %c0_10 = arith.constant 0 : index
    %12 = vector.load %arg5[%c0_9, %c0_10] : memref<1x128xf32, #tpu.memory_space<vmem>>, vector<1x128xf32>
    %13 = vector.broadcast %12 : vector<1x128xf32> to vector<104x128xf32>
    %14 = arith.addf %11, %13 : vector<104x128xf32>
    %c0_11 = arith.constant 0 : index
    %c0_12 = arith.constant 0 : index
    %15 = vector.load %arg1[%c0_11, %c0_12] : memref<104x128xf32, #tpu.memory_space<vmem>>, vector<104x128xf32>
    %16 = arith.addf %14, %15 : vector<104x128xf32>
    %c0_13 = arith.constant 0 : index
    %c0_14 = arith.constant 0 : index
    %17 = vector.load %arg6[%c0_13, %c0_14] : memref<104x128xf32, #tpu.memory_space<vmem>>, vector<104x128xf32>
    tpu.vector_store %arg6[%c0_13, %c0_14], %16 {strides = array<i32>} : memref<104x128xf32, #tpu.memory_space<vmem>>, vector<104x128xf32>,
    return
  }
  func.func @transform_0(%arg0: i32) -> (i32, i32) {
    %c0_i32 = arith.constant 0 : i32
    %c0_i32_0 = arith.constant 0 : i32
    return %arg0, %c0_i32 : i32, i32
  }
  func.func @transform_1(%arg0: i32) -> (i32, i32) {
    %c0_i32 = arith.constant 0 : i32
    %c0_i32_0 = arith.constant 0 : i32
    %c0_i32_1 = arith.constant 0 : i32
    return %c0_i32, %c0_i32_0 : i32, i32
  }
  func.func @transform_2(%arg0: i32) -> (i32, i32) {
    %c0_i32 = arith.constant 0 : i32
    %c0_i32_0 = arith.constant 0 : i32
    %c0_i32_1 = arith.constant 0 : i32
    return %c0_i32, %c0_i32_0 : i32, i32
  }
  func.func @transform_3(%arg0: i32) -> (i32, i32) {
    %c0_i32 = arith.constant 0 : i32
    %c0_i32_0 = arith.constant 0 : i32
    %c0_i32_1 = arith.constant 0 : i32
    return %c0_i32, %c0_i32_0 : i32, i32
  }
  func.func @transform_4(%arg0: i32) -> (i32, i32) {
    %c0_i32 = arith.constant 0 : i32
    %c0_i32_0 = arith.constant 0 : i32
    %c0_i32_1 = arith.constant 0 : i32
    return %c0_i32, %c0_i32_0 : i32, i32
  }
  func.func @transform_5(%arg0: i32) -> (i32, i32) {
    %c0_i32 = arith.constant 0 : i32
    %c0_i32_0 = arith.constant 0 : i32
    return %arg0, %c0_i32 : i32, i32
  }
}

</mosaic_0001>

<bundles_post_ra>
// kernel: tpu_custom_call.1
= control target key start
LH: loop header
LB: loop body
LE: loop exit
PB: predicated region body
PF: predicated region fallthrough
CT: control target
= control target key end

     0   :  { %s1298_s0 = inlined_call_operand.hbm [shape: f32[208,128], index: 0, kind: input, shape index: {}]   ;;  %s1299_s1 = inlined_call_operand.hbm [shape: bf16[128,128], index: 1, kind: input, shape index: {}]   ;;  %s1300_s2 = inlined_call_operand.vmem [shape: f32[1,128], index: 2, kind: input, shape index: {}]   ;;  %s1301_s3 = inlined_call_operand.hbm [shape: bf16[128,128], index: 3, kind: input, shape index: {}]   ;;  %s1302_s4 = inlined_call_operand.vmem [shape: f32[1,128], index: 4, kind: input, shape index: {}]   ;;  %s1303_s5 = inlined_call_operand.hbm [shape: f32[208,128], index: 5, kind: output, shape index: {}]  }
   0x1   :  { %1304 = sst [smem:[#allocation12_spill]] %s1299_s1 }
   0x2   :  { %10 = vsyncpa [#allocation3], 0 }
   0x3   :  { %12 = vsyncpa [#allocation3 + $0x1], 0 }
   0x4   :  { %13 = vsyncpa [#allocation6], 0 }
   0x5   :  { %14 = vsyncpa [#allocation4], 0 }
   0x6   :  { %16 = vsyncpa [#allocation4 + $0x1], 0  ;;  %s1063_s18 = smov 0   ;;  %s1065_s19 = smov 0  }
   0x7   :  { %s1067_s20 = smov 0   ;;  %s1069_s21 = smov 0  }
   0x8 LB: > { %s1084_s22 = sadd.s32 4294967295, %s1023_s21   ;;  %s676_s23 = sadd.s32 4294967294, %s1023_s21   ;;  %s1023_s21 = sphi %s1069_s21, %s1315_s21   ;;  %s1019_s20 = sphi %s1067_s20, %s1314_s20   ;;  %s1015_s19 = sphi %s1065_s19, %s1313_s19   ;;  %s1011_s18 = sphi %s1063_s18, %s1312_s18  }
   0x9   : > { %p42_p0 = scmp.ne.s32.totalorder %s1015_s19, %s1011_s18  ;;  %p43_p1 = scmp.eq.s32.totalorder %s1084_s22, 0 }
   0xa   : > { %p150_p2 = scmp.eq.s32.totalorder %s1084_s22, 1  ;;  %p156_p3 = scmp.eq.s32.totalorder %s676_s23, 1 }
   0xb   : > { %p1093_p4 = por %p43_p1, %p42_p0  ;;  %p677_p5 = scmp.ge.s32.totalorder %s1023_s21, 1 }
   0xc   : > { %p1098_p6 = por %p156_p3, %p42_p0  ;;  %p163_p7 = scmp.lt.s32.totalorder %s1023_s21, 3 }
   0xd   : > { %s1307_s1 = sld [smem:[#allocation12_spill]]  ;;  %s1025_s30 = smov [#allocation5]  }
   0xe   : > { %p1106_p8 = pnand %p677_p5, %p163_p7  ;;  %s176_s6 = sshll.u32 %s1025_s30, 4  ;;  %s177_s6 = int_to_ptr.vmem [resolvable:$true] %s176_s6 }
   0xf   : > { %s191_s9 = sshll.u32 %s1301_s3, 4  ;;  %s1026_s10 = smov 64   ;;  %s192_s9 = int_to_ptr.hbm [resolvable:$true] %s191_s9 }
  0x10   : > { %p800_p9 = pneg %p1106_p8  ;;  %s1027_s11 = smov 4  }
  0x11   : > { %s1028_s12 = smov [#allocation7]   ;;  %s1119_s14 = sadd.s32 1, %s1023_s21  }
  0x12   : > { %p801_p10 = pnand %p800_p9, %p43_p1  ;;  %s193_s13 = sshll.u32 %s1028_s12, 4  ;;  %s194_s13 = int_to_ptr.vmem [resolvable:$true] %s193_s13 }
  0x13   : > { %s174_s28 = sshll.u32 %s1307_s1, 4  ;;  %s29_s15 = sadd.s32 1, %s1019_s20  ;;  %s175_s28 = int_to_ptr.hbm [resolvable:$true] %s174_s28 }
  0x14   : > { %803 = dma.hbm_to_vmem [thread:$0]  (!%p801_p10), %s175_s28, 1024, %s177_s6, [#allocation6], %s1026_s10, %s1026_s10, %s1027_s11  }
  0x15   : > { %806 = dma.hbm_to_vmem [thread:$0]  (!%p801_p10), %s192_s9, 1024, %s194_s13, [#allocation6], %s1026_s10, %s1026_s10, %s1027_s11  }
  0x16   : > { %s26_s16 = ssub.s32 %s1023_s21, %s1119_s14  ;;  %p36_p12 = scmp.ne.s32.totalorder %s1019_s20, %s1015_s19 }
  0x17   : > { %p27_p13 = scmp.eq.s32.totalorder %s26_s16, 0  ;;  %p37_p0 = scmp.eq.s32.totalorder %s1023_s21, 0 }
  0x18   : > { %p1129_p3 = por %p150_p2, %p36_p12  ;;  %p817_p5 = scmp.lt.s32.totalorder %s1023_s21, 2 }
  0x19   : > { %s1135_s23 = scalar_select %p27_p13, %s1019_s20, %s29_s15  }
  0x1a   : > { %p38_p7 = por %p37_p0, %p36_p12  ;;  %s210_s26 = sand.u32 1, %s1019_s20  }
  0x1b   : > { %s786_s27 = smul.u32 104, %s210_s26  ;;  %s211_s12 = scalar_lea.sflag [#allocation3], %s210_s26 }
  0x1c   : > { %s752_s28 = smul.u32 104, %s1023_s21  ;;  %p1139_p9 = pnand %p817_p5, %p38_p7 }
  0x1d   : > { %s214_s9 = scalar_lea.vmem [#allocation2], %s786_s27  ;;  %s930_s6 = scalar_lea.hbm %s1298_s0, 208 }
  0x1e   : > { %s219_s8 = scalar_lea.hbm %s1298_s0, %s752_s28  ;;  %s222_s10 = sshll.u32 %s214_s9, 4  ;;  %s223_s10 = int_to_ptr.vmem [resolvable:$true] %s222_s10 }
  0x1f   : > { %s220_s11 = sshll.u32 %s219_s8, 4  ;;  %p927_p10 = pneg %p1139_p9  ;;  %s221_s11 = int_to_ptr.hbm [resolvable:$true] %s220_s11 }
  0x20   : > { %s923_s13 = sshra.s32 %s221_s11, 4  ;;  %s924_s13 = int_to_ptr.hbm [resolvable:$true] %s923_s13 }
  0x21   : > { %s925_s15 = scalar_lea.hbm %s924_s13, 104  ;;  %p931_p0 = scmp.lt.s32.totalorder %s924_s13, %s1298_s0 }
  0x22   : > { %p926_p2 = scmp.ne.s32.totalorder %s924_s13, %s925_s15  ;;  %p932_p5 = scmp.lt.s32.totalorder %s930_s6, %s925_s15 }
  0x24   : > { %p928_p12 = pnand %p927_p10, %p926_p2  ;;  %p933_p7 = por %p932_p5, %p931_p0 }
  0x26   : > { %p929_p13 = pneg %p928_p12 }
  0x28   : > { %p934_p11 = pnand %p933_p7, %p929_p13 }
  0x2a   : > { %937 = shalt.err (!%p934_p11)
}
  0x2b   : > { %s1029_s26 = smov 128   ;;  %s1030_s27 = smov 8  }
  0x2c   : > { %810 = dma.hbm_to_vmem [thread:$0]  (!%p1139_p9), %s221_s11, 1664, %s223_s10, %s211_s12, %s1029_s26, %s1029_s26, %s1030_s27  }
  0x2d   : > { %234 = sbr.rel (%p1106_p8) target bundleno = 419 (0x1a3), region = 40  ;;  %s1159_s1 = sand.u32 (!%p1106_p8), 1, %s1015_s19  }
  0x2e   : > { %s787_s8 = smul.u32 (!%p1106_p8), 104, %s1159_s1  ;;  %s237_s9 = scalar_lea.sflag (!%p1106_p8), [#allocation3], %s1159_s1 }
  0x30   : > { %s1165_s13 = scalar_lea.vmem (!%p1106_p8), [#allocation2], %s787_s8 }
  0x32   : > { %998 = dma.done.wait (%p1093_p4), %s237_s9, 1664  }
  0x33   : > { %1000 = vsyncadd (%p1093_p4), %s237_s9, 4294965632 }
  0x34   : > { %1002 = dma.done.wait (%p43_p1), [#allocation6], 2048  }
  0x35   : > { %1004 = vsyncadd (%p43_p1), [#allocation6], 4294965248  ;;  %v760_v0 = vld [vmem:[#allocation5 + $0x38] sm:$0xff]  ;;  %v759_v1 = vld [vmem:[#allocation5 + $0x30] sm:$0xff]  ;;  %s1237_s11 = scalar_lea.vmem [#allocation8], %s787_s8  ;;  %s769_s12 = smul.u32 104, %s1084_s22 }
  0x36   : > { %368 = vmatpush.bf16.msra.mxu0 %v760_v0  ;;  %770 = vmatpush.bf16.msra.mxu2 %v760_v0  ;;  %v758_v2 = vld [vmem:[#allocation5 + $0x28] sm:$0xff]  ;;  %v757_v3 = vld [vmem:[#allocation5 + $0x20] sm:$0xff]  ;;  %v756_v4 = vld [vmem:[#allocation5 + $0x18] sm:$0xff]  ;;  %s581_s7 = sshll.u32 %s1237_s11, 4  ;;  %s569_s22 = scalar_lea.sflag [#allocation4], %s1159_s1  ;;  %s582_s7 = int_to_ptr.vmem [resolvable:$true] %s581_s7 }
  0x37   : > { %v755_v5 = vld [vmem:[#allocation5 + $0x10] sm:$0xff]  ;;  %v754_v6 = vld [vmem:[#allocation5 + $0x8] sm:$0xff]  ;;  %v753_v7 = vld [vmem:[#allocation5] sm:$0xff]  ;;  %s580_s6 = scalar_lea.hbm %s1303_s5, %s769_s12 }
  0x38   : > { %v1176_v8 = vld [vmem:[%s1165_s13] sm:$0xff]  ;;  %v1179_v9 = vld [vmem:[%s1165_s13 + $0x8] sm:$0xff]  ;;  %v1182_v10 = vld [vmem:[%s1165_s13 + $0x30] sm:$0xff]  ;;  %s583_s28 = sshll.u32 %s580_s6, 4  ;;  %s584_s28 = int_to_ptr.hbm [resolvable:$true] %s583_s28 }
  0x39   : > { %v1185_v11 = vld [vmem:[%s1165_s13 + $0x38] sm:$0xff]  ;;  %v293_v12 = vpack.c.bf16 %v1179_v9, %v1176_v8  ;;  %v1192_v14 = vld [vmem:[%s1165_s13 + $0x10] sm:$0xff]  ;;  %v1198_v16 = vld [vmem:[%s1165_s13 + $0x40] sm:$0xff]  ;;  %s967_s26 = sshra.s32 %s584_s28, 4  ;;  %s968_s26 = int_to_ptr.hbm [resolvable:$true] %s967_s26 }
  0x3a   : > { %369 = vmatpush.bf16.msra.mxu0 %v759_v1  ;;  %771 = vmatpush.bf16.msra.mxu2 %v759_v1  ;;  %v296_v13 = vpack.c.bf16 %v1185_v11, %v1182_v10  ;;  %v1195_v15 = vld [vmem:[%s1165_s13 + $0x18] sm:$0xff]  ;;  %v1201_v17 = vld [vmem:[%s1165_s13 + $0x48] sm:$0xff]  ;;  %v1208_v23 = vld [vmem:[%s1165_s13 + $0x20] sm:$0xff]  ;;  %s969_s27 = scalar_lea.hbm %s968_s26, 104  ;;  %p974_p11 = scmp.lt.s32.totalorder %s968_s26, %s1303_s5 }
  0x3b   : > { %v294_v18 = vpack.c.bf16 %v1195_v15, %v1192_v14  ;;  %v297_v19 = vpack.c.bf16 %v1201_v17, %v1198_v16  ;;  %v768_v20 = vld [vmem:[#allocation7 + $0x38] sm:$0xff]  ;;  %v767_v21 = vld [vmem:[#allocation7 + $0x30] sm:$0xff]  ;;  %v766_v22 = vld [vmem:[#allocation7 + $0x28] sm:$0xff]  ;;  %p970_p1 = scmp.ne.s32.totalorder %s968_s26, %s969_s27 }
  0x3c   : > { %499 = vmatpush.bf16.msra.mxu1 %v768_v20  ;;  %778 = vmatpush.bf16.msra.mxu3 %v768_v20  ;;  %v1211_v24 = vld [vmem:[%s1165_s13 + $0x28] sm:$0xff]  ;;  %v1214_v25 = vld [vmem:[%s1165_s13 + $0x50] sm:$0xff]  ;;  %v1217_v26 = vld [vmem:[%s1165_s13 + $0x58] sm:$0xff] }
  0x3d   : > { %v765_v27 = vld [vmem:[#allocation7 + $0x20] sm:$0xff]  ;;  %v295_v28 = vpack.c.bf16 %v1211_v24, %v1208_v23  ;;  %v298_v29 = vpack.c.bf16 %v1217_v26, %v1214_v25  ;;  %v1224_v30 = vld [vmem:[%s1165_s13 + $0x60] sm:$0xff]  ;;  %v762_v34 = vld [vmem:[#allocation7 + $0x8] sm:$0xff]  ;;  %p971_p4 = pnand %p970_p1, %p1129_p3  ;;  %s973_s13 = scalar_lea.hbm %s1303_s5, 208 }
  0x3e   : > { %370 = vmatpush.bf16.msra.mxu0 %v758_v2  ;;  %772 = vmatpush.bf16.msra.mxu2 %v758_v2  ;;  %v299_v31 = vpack.c.bf16 %v1224_v30, %v1224_v30  ;;  %v764_v32 = vld [vmem:[#allocation7 + $0x18] sm:$0xff]  ;;  %v763_v33 = vld [vmem:[#allocation7 + $0x10] sm:$0xff]  ;;  %v761_v35 = vld [vmem:[#allocation7] sm:$0xff]  ;;  %p975_p9 = scmp.lt.s32.totalorder %s973_s13, %s969_s27 }
  0x3f   : > { %v861_v37 = vld [vmem:[%s1300_s2] ss:$0 sm:$0xff]  ;;  %p972_p8 = pneg %p971_p4 }
  0x40   : > { %500 = vmatpush.bf16.msra.mxu1 %v767_v21  ;;  %779 = vmatpush.bf16.msra.mxu3 %v767_v21  ;;  %p976_p2 = por %p975_p9, %p974_p11 }
  0x42   : > { %371 = vmatpush.bf16.msra.mxu0 %v757_v3  ;;  %773 = vmatpush.bf16.msra.mxu2 %v757_v3  ;;  %p977_p10 = pnand %p976_p2, %p972_p8 }
  0x44   : > { %501 = vmatpush.bf16.msra.mxu1 %v766_v22  ;;  %780 = vmatpush.bf16.msra.mxu3 %v766_v22 }
  0x46   : > { %372 = vmatpush.bf16.msra.mxu0 %v756_v4  ;;  %774 = vmatpush.bf16.msra.mxu2 %v756_v4 }
  0x48   : > { %502 = vmatpush.bf16.msra.mxu1 %v765_v27  ;;  %781 = vmatpush.bf16.msra.mxu3 %v765_v27 }
  0x4a   : > { %373 = vmatpush.bf16.msra.mxu0 %v755_v5  ;;  %775 = vmatpush.bf16.msra.mxu2 %v755_v5 }
  0x4c   : > { %503 = vmatpush.bf16.msra.mxu1 %v764_v32  ;;  %782 = vmatpush.bf16.msra.mxu3 %v764_v32 }
  0x4e   : > { %374 = vmatpush.bf16.msra.mxu0 %v754_v6  ;;  %776 = vmatpush.bf16.msra.mxu2 %v754_v6 }
  0x50   : > { %504 = vmatpush.bf16.msra.mxu1 %v763_v33  ;;  %783 = vmatpush.bf16.msra.mxu3 %v763_v33  ;;  %v862_v33 = vld [vmem:[%s1302_s4] ss:$0 sm:$0xff] }
  0x52   : > { %375 = vmatpush.bf16.msra.mxu0 %v753_v7  ;;  %777 = vmatpush.bf16.msra.mxu2 %v753_v7 }
  0x54   : > { %505 = vmatpush.bf16.msra.mxu1 %v762_v34  ;;  %784 = vmatpush.bf16.msra.mxu3 %v762_v34 }
  0x55   : > { %376 = vmatmul.bf16.vlgmr.msra.gmra.mxu0 %v293_v12  ;;  %391 = vmatmul.bf16.vlgmr.msra.gmra.mxu2 %v296_v13 }
  0x58   : > { %506 = vmatpush.bf16.msra.mxu1 %v761_v35  ;;  %785 = vmatpush.bf16.msra.mxu3 %v761_v35 }
  0x65   : > { %381 = vmatmul.bf16.gmra.mxu0 %v294_v18  ;;  %396 = vmatmul.bf16.gmra.mxu2 %v297_v19 }
  0x75   : > { %386 = vmatmul.bf16.gmra.mxu0 %v295_v28  ;;  %401 = vmatmul.bf16.gmra.mxu2 %v298_v29 }
  0x85   : > { %406 = vmatmul.bf16.gmra.mxu2 %v299_v31 }
  0xd2   : > { %v377_v36 = vpop.f32.mrf.mxu0 }
  0xd3   : > { %v378_v39 = vadd.f32 %v861_v37, %v377_v36 }
  0xd5   : > { %v411_v42 = vmax.f32 %v378_v39, 0.0 }
  0xd8   : > { %v392_v38 = vpop.f32.mrf.mxu2 }
  0xd9   : > { %v393_v20 = vadd.f32 %v861_v37, %v392_v38 }
  0xda   : > { %v379_v40 = vpop.f32.mrf.mxu0 }
  0xdb   : > { %v380_v41 = vadd.f32 %v861_v37, %v379_v40  ;;  %v417_v27 = vmax.f32 %v393_v20, 0.0 }
  0xdd   : > { %v412_v43 = vmax.f32 %v380_v41, 0.0 }
  0xdf   : > { %v424_v44 = vpack.c.bf16 %v412_v43, %v411_v42 }
  0xe0   : > { %v394_v45 = vpop.f32.mrf.mxu2 }
  0xe1   : > { %507 = vmatmul.bf16.vlgmr.msra.gmra.mxu1 %v424_v44  ;;  %v395_v18 = vadd.f32 %v861_v37, %v394_v45 }
  0xe2   : > { %v382_v46 = vpop.f32.mrf.mxu0 }
  0xe3   : > { %v383_v48 = vadd.f32 %v861_v37, %v382_v46  ;;  %v418_v21 = vmax.f32 %v395_v18, 0.0 }
  0xe5   : > { %v413_v51 = vmax.f32 %v383_v48, 0.0  ;;  %v427_v29 = vpack.c.bf16 %v418_v21, %v417_v27 }
  0xe8   : > { %v397_v47 = vpop.f32.mrf.mxu2 }
  0xe9   : > { %v398_v53 = vadd.f32 %v861_v37, %v397_v47 }
  0xea   : > { %v384_v49 = vpop.f32.mrf.mxu0 }
  0xeb   : > { %v385_v50 = vadd.f32 %v861_v37, %v384_v49  ;;  %v419_v58 = vmax.f32 %v398_v53, 0.0 }
  0xed   : > { %v414_v52 = vmax.f32 %v385_v50, 0.0 }
  0xef   : > { %v425_v54 = vpack.c.bf16 %v414_v52, %v413_v51 }
  0xf0   : > { %v399_v55 = vpop.f32.mrf.mxu2 }
  0xf1   : > { %v400_v56 = vadd.f32 %v861_v37, %v399_v55  ;;  %512 = vmatmul.bf16.gmra.mxu1 %v425_v54 }
  0xf2   : > { %v387_v57 = vpop.f32.mrf.mxu0 }
  0xf3   : > { %v420_v59 = vmax.f32 %v400_v56, 0.0  ;;  %v388_v62 = vadd.f32 %v861_v37, %v387_v57 }
  0xf5   : > { %v428_v60 = vpack.c.bf16 %v420_v59, %v419_v58  ;;  %v415_v1 = vmax.f32 %v388_v62, 0.0 }
  0xf7   : > { %527 = vmatmul.bf16.vlgmr.msra.gmra.mxu3 %v428_v60 }
  0xf8   : > { %v402_v61 = vpop.f32.mrf.mxu2 }
  0xf9   : > { %v403_v3 = vadd.f32 %v861_v37, %v402_v61 }
  0xfa   : > { %v389_v63 = vpop.f32.mrf.mxu0 }
  0xfb   : > { %v390_v0 = vadd.f32 %v861_v37, %v389_v63  ;;  %v421_v7 = vmax.f32 %v403_v3, 0.0 }
  0xfd   : > { %v416_v2 = vmax.f32 %v390_v0, 0.0 }
  0xff   : > { %v426_v4 = vpack.c.bf16 %v416_v2, %v415_v1 }
 0x100   : > { %v404_v5 = vpop.f32.mrf.mxu2 }
 0x101   : > { %v405_v6 = vadd.f32 %v861_v37, %v404_v5  ;;  %517 = vmatmul.bf16.gmra.mxu1 %v426_v4 }
 0x103   : > { %v422_v12 = vmax.f32 %v405_v6, 0.0 }
 0x105   : > { %v429_v13 = vpack.c.bf16 %v422_v12, %v421_v7 }
 0x107   : > { %532 = vmatmul.bf16.gmra.mxu3 %v429_v13 }
 0x108   : > { %v407_v19 = vpop.f32.mrf.mxu2 }
 0x109   : > { %v408_v22 = vadd.f32 %v861_v37, %v407_v19 }
 0x10b   : > { %v423_v28 = vmax.f32 %v408_v22, 0.0 }
 0x10d   : > { %v430_v32 = vpack.c.bf16 %v423_v28, %v423_v28 }
 0x110   : > { %v409_v31 = vpop.f32.mrf.mxu2 }
 0x111   : > { %522 = vmatmul.bf16.gmra.mxu1 %v427_v29 }
 0x117   : > { %537 = vmatmul.bf16.gmra.mxu3 %v430_v32 }
 0x15e   : > { %v508_v34 = vpop.f32.mrf.mxu1 }
 0x15f   : > { %v509_v35 = vadd.f32 %v862_v33, %v508_v34 }
 0x161   : > { %v542_v36 = vadd.f32 %v509_v35, %v1176_v8 }
 0x163   : > { %555 = vst [vmem:[%s1237_s11] sm:$0xff] %v542_v36 }
 0x166   : > { %v510_v37 = vpop.f32.mrf.mxu1 }
 0x167   : > { %v511_v38 = vadd.f32 %v862_v33, %v510_v37 }
 0x169   : > { %v543_v39 = vadd.f32 %v511_v38, %v1179_v9 }
 0x16b   : > { %556 = vst [vmem:[%s1237_s11 + $0x8] sm:$0xff] %v543_v39 }
 0x16e   : > { %v513_v40 = vpop.f32.mrf.mxu1 }
 0x16f   : > { %v514_v41 = vadd.f32 %v862_v33, %v513_v40 }
 0x171   : > { %v544_v42 = vadd.f32 %v514_v41, %v1192_v14 }
 0x173   : > { %557 = vst [vmem:[%s1237_s11 + $0x10] sm:$0xff] %v544_v42 }
 0x176   : > { %v515_v8 = vpop.f32.mrf.mxu1 }
 0x177   : > { %v516_v43 = vadd.f32 %v862_v33, %v515_v8 }
 0x179   : > { %v545_v44 = vadd.f32 %v516_v43, %v1195_v15 }
 0x17a   : > { %v528_v45 = vpop.f32.mrf.mxu3 }
 0x17b   : > { %558 = vst [vmem:[%s1237_s11 + $0x18] sm:$0xff] %v545_v44  ;;  %v529_v46 = vadd.f32 %v862_v33, %v528_v45 }
 0x17d   : > { %v550_v47 = vadd.f32 %v529_v46, %v1198_v16 }
 0x17e   : > { %v518_v48 = vpop.f32.mrf.mxu1 }
 0x17f   : > { %563 = vst [vmem:[%s1237_s11 + $0x40] sm:$0xff] %v550_v47  ;;  %v519_v9 = vadd.f32 %v862_v33, %v518_v48 }
 0x181   : > { %v546_v49 = vadd.f32 %v519_v9, %v1208_v23 }
 0x182   : > { %v530_v50 = vpop.f32.mrf.mxu3 }
 0x183   : > { %559 = vst [vmem:[%s1237_s11 + $0x20] sm:$0xff] %v546_v49  ;;  %v531_v14 = vadd.f32 %v862_v33, %v530_v50 }
 0x185   : > { %v551_v51 = vadd.f32 %v531_v14, %v1201_v17 }
 0x186   : > { %v520_v15 = vpop.f32.mrf.mxu1 }
 0x187   : > { %564 = vst [vmem:[%s1237_s11 + $0x48] sm:$0xff] %v551_v51  ;;  %v521_v52 = vadd.f32 %v862_v33, %v520_v15 }
 0x189   : > { %v547_v53 = vadd.f32 %v521_v52, %v1211_v24 }
 0x18a   : > { %v533_v16 = vpop.f32.mrf.mxu3 }
 0x18b   : > { %560 = vst [vmem:[%s1237_s11 + $0x28] sm:$0xff] %v547_v53  ;;  %v534_v54 = vadd.f32 %v862_v33, %v533_v16 }
 0x18d   : > { %v552_v55 = vadd.f32 %v534_v54, %v1214_v25 }
 0x18e   : > { %v523_v23 = vpop.f32.mrf.mxu1 }
 0x18f   : > { %565 = vst [vmem:[%s1237_s11 + $0x50] sm:$0xff] %v552_v55  ;;  %v524_v56 = vadd.f32 %v862_v33, %v523_v23 }
 0x191   : > { %v548_v57 = vadd.f32 %v524_v56, %v1182_v10 }
 0x192   : > { %v535_v58 = vpop.f32.mrf.mxu3 }
 0x193   : > { %561 = vst [vmem:[%s1237_s11 + $0x30] sm:$0xff] %v548_v57  ;;  %v536_v17 = vadd.f32 %v862_v33, %v535_v58 }
 0x195   : > { %v553_v24 = vadd.f32 %v536_v17, %v1217_v26 }
 0x196   : > { %v525_v59 = vpop.f32.mrf.mxu1 }
 0x197   : > { %566 = vst [vmem:[%s1237_s11 + $0x58] sm:$0xff] %v553_v24  ;;  %v526_v25 = vadd.f32 %v862_v33, %v525_v59 }
 0x199   : > { %v549_v60 = vadd.f32 %v526_v25, %v1185_v11 }
 0x19a   : > { %v538_v10 = vpop.f32.mrf.mxu3 }
 0x19b   : > { %562 = vst [vmem:[%s1237_s11 + $0x38] sm:$0xff] %v549_v60  ;;  %v539_v61 = vadd.f32 %v862_v33, %v538_v10 }
 0x19d   : > { %v554_v62 = vadd.f32 %v539_v61, %v1224_v30 }
 0x19f   : > { %567 = vst [vmem:[%s1237_s11 + $0x60] sm:$0xff] %v554_v62 }
 0x1a0   : > { %980 = shalt.err (!%p977_p10)
}
 0x1a1   : > { %s1031_s1 = smov 128   ;;  %s1032_s30 = smov 8  }
 0x1a2   : > { %798 = dma.vmem_to_hbm [thread:$0]  (%p1129_p3), %s582_s7, 1664, %s584_s28, %s569_s22, %s1031_s1, %s1031_s1, %s1032_s30   ;;  %v540_v11 = vpop.f32.mrf.mxu3 }
 0x1a3 PF: > { %s598_s10 = sand.u32 1, %s1011_s18   ;;  %p1311_p12 = scmp.ge.s32.totalorder %s1023_s21, 2 }
 0x1a4   : > { %s599_s11 = scalar_lea.sflag [#allocation4], %s598_s10 }
 0x1a5   : > { %p812_p13 = pnand %p1311_p12, %p1098_p6 }
 0x1a7   : > { %p813_p0 = pneg %p812_p13 }
 0x1a9   : > { %1006 = dma.done.wait (%p813_p0), %s599_s11, 1664  }
 0x1aa   : > { %1008 = vsyncadd (%p813_p0), %s599_s11, 4294965632  ;;  %p19_p5 = scmp.ge.s32.totalorder %s1119_s14, 4   ;;  %s1312_s18 = smov %s1015_s19 }
 0x1ab   : > { %s1313_s19 = smov %s1019_s20  ;;  %s1314_s20 = smov %s1135_s23 }
 0x1ac   : > { %s1315_s21 = smov %s1119_s14  ;;  %21 = sbr.rel (!%p19_p5) target bundleno = 8 (0x8), region = 93 }
 0x1b1   :  { %605 = vsyncpa [#allocation3], 1 }
 0x1b2   :  { %607 = vsyncpa [#allocation3 + $0x1], 1 }
 0x1b3   :  { %608 = vsyncpa [#allocation6], 1 }
 0x1b4   :  { %609 = vsyncpa [#allocation4], 1 }
 0x1b5   :  { %611 = vsyncpa [#allocation4 + $0x1], 1 }

// kernel: tpu_custom_call.1
= control target key start
LH: loop header
LB: loop body
LE: loop exit
PB: predicated region body
PF: predicated region fallthrough
CT: control target
= control target key end

     0   :  { %s1298_s0 = inlined_call_operand.hbm [shape: f32[208,128], index: 0, kind: input, shape index: {}]   ;;  %s1299_s1 = inlined_call_operand.hbm [shape: bf16[128,128], index: 1, kind: input, shape index: {}]   ;;  %s1300_s2 = inlined_call_operand.vmem [shape: f32[1,128], index: 2, kind: input, shape index: {}]   ;;  %s1301_s3 = inlined_call_operand.hbm [shape: bf16[128,128], index: 3, kind: input, shape index: {}]   ;;  %s1302_s4 = inlined_call_operand.vmem [shape: f32[1,128], index: 4, kind: input, shape index: {}]   ;;  %s1303_s5 = inlined_call_operand.hbm [shape: f32[208,128], index: 5, kind: output, shape index: {}]  }
   0x1   :  { %1304 = sst [smem:[#allocation12_spill]] %s1299_s1 }
   0x2   :  { %10 = vsyncpa [#allocation3], 0 }
   0x3   :  { %12 = vsyncpa [#allocation3 + $0x1], 0 }
   0x4   :  { %13 = vsyncpa [#allocation6], 0 }
   0x5   :  { %14 = vsyncpa [#allocation4], 0 }
   0x6   :  { %16 = vsyncpa [#allocation4 + $0x1], 0  ;;  %s1063_s18 = smov 0   ;;  %s1065_s19 = smov 0  }
   0x7   :  { %s1067_s20 = smov 0   ;;  %s1069_s21 = smov 0  }
   0x8 LB: > { %s1084_s22 = sadd.s32 4294967295, %s1023_s21   ;;  %s676_s23 = sadd.s32 4294967294, %s1023_s21   ;;  %s1023_s21 = sphi %s1069_s21, %s1315_s21   ;;  %s1019_s20 = sphi %s1067_s20, %s1314_s20   ;;  %s1015_s19 = sphi %s1065_s19, %s1313_s19   ;;  %s1011_s18 = sphi %s1063_s18, %s1312_s18  }
   0x9   : > { %p42_p0 = scmp.ne.s32.totalorder %s1015_s19, %s1011_s18  ;;  %p43_p1 = scmp.eq.s32.totalorder %s1084_s22, 0 }
   0xa   : > { %p150_p2 = scmp.eq.s32.totalorder %s1084_s22, 1  ;;  %p156_p3 = scmp.eq.s32.totalorder %s676_s23, 1 }
   0xb   : > { %p1093_p4 = por %p43_p1, %p42_p0  ;;  %p677_p5 = scmp.ge.s32.totalorder %s1023_s21, 1 }
   0xc   : > { %p1098_p6 = por %p156_p3, %p42_p0  ;;  %p163_p7 = scmp.lt.s32.totalorder %s1023_s21, 3 }
   0xd   : > { %s1307_s1 = sld [smem:[#allocation12_spill]]  ;;  %s1025_s30 = smov [#allocation5]  }
   0xe   : > { %p1106_p8 = pnand %p677_p5, %p163_p7  ;;  %s176_s6 = sshll.u32 %s1025_s30, 4  ;;  %s177_s6 = int_to_ptr.vmem [resolvable:$true] %s176_s6 }
   0xf   : > { %s191_s9 = sshll.u32 %s1301_s3, 4  ;;  %s1026_s10 = smov 64   ;;  %s192_s9 = int_to_ptr.hbm [resolvable:$true] %s191_s9 }
  0x10   : > { %p800_p9 = pneg %p1106_p8  ;;  %s1027_s11 = smov 4  }
  0x11   : > { %s1028_s12 = smov [#allocation7]   ;;  %s1119_s14 = sadd.s32 1, %s1023_s21  }
  0x12   : > { %p801_p10 = pnand %p800_p9, %p43_p1  ;;  %s193_s13 = sshll.u32 %s1028_s12, 4  ;;  %s194_s13 = int_to_ptr.vmem [resolvable:$true] %s193_s13 }
  0x13   : > { %s174_s28 = sshll.u32 %s1307_s1, 4  ;;  %s29_s15 = sadd.s32 1, %s1019_s20  ;;  %s175_s28 = int_to_ptr.hbm [resolvable:$true] %s174_s28 }
  0x14   : > { %803 = dma.hbm_to_vmem [thread:$0]  (!%p801_p10), %s175_s28, 1024, %s177_s6, [#allocation6], %s1026_s10, %s1026_s10, %s1027_s11  }
  0x15   : > { %806 = dma.hbm_to_vmem [thread:$0]  (!%p801_p10), %s192_s9, 1024, %s194_s13, [#allocation6], %s1026_s10, %s1026_s10, %s1027_s11  }
  0x16   : > { %s26_s16 = ssub.s32 %s1023_s21, %s1119_s14  ;;  %p36_p12 = scmp.ne.s32.totalorder %s1019_s20, %s1015_s19 }
  0x17   : > { %p27_p13 = scmp.eq.s32.totalorder %s26_s16, 0  ;;  %p37_p0 = scmp.eq.s32.totalorder %s1023_s21, 0 }
  0x18   : > { %p1129_p3 = por %p150_p2, %p36_p12  ;;  %p817_p5 = scmp.lt.s32.totalorder %s1023_s21, 2 }
  0x19   : > { %s1135_s23 = scalar_select %p27_p13, %s1019_s20, %s29_s15  }
  0x1a   : > { %p38_p7 = por %p37_p0, %p36_p12  ;;  %s210_s26 = sand.u32 1, %s1019_s20  }
  0x1b   : > { %s786_s27 = smul.u32 104, %s210_s26  ;;  %s211_s12 = scalar_lea.sflag [#allocation3], %s210_s26 }
  0x1c   : > { %s752_s28 = smul.u32 104, %s1023_s21  ;;  %p1139_p9 = pnand %p817_p5, %p38_p7 }
  0x1d   : > { %s214_s9 = scalar_lea.vmem [#allocation2], %s786_s27  ;;  %s930_s6 = scalar_lea.hbm %s1298_s0, 208 }
  0x1e   : > { %s219_s8 = scalar_lea.hbm %s1298_s0, %s752_s28  ;;  %s222_s10 = sshll.u32 %s214_s9, 4  ;;  %s223_s10 = int_to_ptr.vmem [resolvable:$true] %s222_s10 }
  0x1f   : > { %s220_s11 = sshll.u32 %s219_s8, 4  ;;  %p927_p10 = pneg %p1139_p9  ;;  %s221_s11 = int_to_ptr.hbm [resolvable:$true] %s220_s11 }
  0x20   : > { %s923_s13 = sshra.s32 %s221_s11, 4  ;;  %s924_s13 = int_to_ptr.hbm [resolvable:$true] %s923_s13 }
  0x21   : > { %s925_s15 = scalar_lea.hbm %s924_s13, 104  ;;  %p931_p0 = scmp.lt.s32.totalorder %s924_s13, %s1298_s0 }
  0x22   : > { %p926_p2 = scmp.ne.s32.totalorder %s924_s13, %s925_s15  ;;  %p932_p5 = scmp.lt.s32.totalorder %s930_s6, %s925_s15 }
  0x24   : > { %p928_p12 = pnand %p927_p10, %p926_p2  ;;  %p933_p7 = por %p932_p5, %p931_p0 }
  0x26   : > { %p929_p13 = pneg %p928_p12 }
  0x28   : > { %p934_p11 = pnand %p933_p7, %p929_p13 }
  0x2a   : > { %937 = shalt.err (!%p934_p11)
}
  0x2b   : > { %s1029_s26 = smov 128   ;;  %s1030_s27 = smov 8  }
  0x2c   : > { %810 = dma.hbm_to_vmem [thread:$0]  (!%p1139_p9), %s221_s11, 1664, %s223_s10, %s211_s12, %s1029_s26, %s1029_s26, %s1030_s27  }
  0x2d   : > { %234 = sbr.rel (%p1106_p8) target bundleno = 419 (0x1a3), region = 40  ;;  %s1159_s1 = sand.u32 (!%p1106_p8), 1, %s1015_s19  }
  0x2e   : > { %s787_s8 = smul.u32 (!%p1106_p8), 104, %s1159_s1  ;;  %s237_s9 = scalar_lea.sflag (!%p1106_p8), [#allocation3], %s1159_s1 }
  0x30   : > { %s1165_s13 = scalar_lea.vmem (!%p1106_p8), [#allocation2], %s787_s8 }
  0x32   : > { %998 = dma.done.wait (%p1093_p4), %s237_s9, 1664  }
  0x33   : > { %1000 = vsyncadd (%p1093_p4), %s237_s9, 4294965632 }
  0x34   : > { %1002 = dma.done.wait (%p43_p1), [#allocation6], 2048  }
  0x35   : > { %1004 = vsyncadd (%p43_p1), [#allocation6], 4294965248  ;;  %v760_v0 = vld [vmem:[#allocation5 + $0x38] sm:$0xff]  ;;  %v759_v1 = vld [vmem:[#allocation5 + $0x30] sm:$0xff]  ;;  %s1237_s11 = scalar_lea.vmem [#allocation8], %s787_s8  ;;  %s769_s12 = smul.u32 104, %s1084_s22 }
  0x36   : > { %368 = vmatpush.bf16.msra.mxu0 %v760_v0  ;;  %770 = vmatpush.bf16.msra.mxu2 %v760_v0  ;;  %v758_v2 = vld [vmem:[#allocation5 + $0x28] sm:$0xff]  ;;  %v757_v3 = vld [vmem:[#allocation5 + $0x20] sm:$0xff]  ;;  %v756_v4 = vld [vmem:[#allocation5 + $0x18] sm:$0xff]  ;;  %s581_s7 = sshll.u32 %s1237_s11, 4  ;;  %s569_s22 = scalar_lea.sflag [#allocation4], %s1159_s1  ;;  %s582_s7 = int_to_ptr.vmem [resolvable:$true] %s581_s7 }
  0x37   : > { %v755_v5 = vld [vmem:[#allocation5 + $0x10] sm:$0xff]  ;;  %v754_v6 = vld [vmem:[#allocation5 + $0x8] sm:$0xff]  ;;  %v753_v7 = vld [vmem:[#allocation5] sm:$0xff]  ;;  %s580_s6 = scalar_lea.hbm %s1303_s5, %s769_s12 }
  0x38   : > { %v1176_v8 = vld [vmem:[%s1165_s13] sm:$0xff]  ;;  %v1179_v9 = vld [vmem:[%s1165_s13 + $0x8] sm:$0xff]  ;;  %v1182_v10 = vld [vmem:[%s1165_s13 + $0x30] sm:$0xff]  ;;  %s583_s28 = sshll.u32 %s580_s6, 4  ;;  %s584_s28 = int_to_ptr.hbm [resolvable:$true] %s583_s28 }
  0x39   : > { %v1185_v11 = vld [vmem:[%s1165_s13 + $0x38] sm:$0xff]  ;;  %v293_v12 = vpack.c.bf16 %v1179_v9, %v1176_v8  ;;  %v1192_v14 = vld [vmem:[%s1165_s13 + $0x10] sm:$0xff]  ;;  %v1198_v16 = vld [vmem:[%s1165_s13 + $0x40] sm:$0xff]  ;;  %s967_s26 = sshra.s32 %s584_s28, 4  ;;  %s968_s26 = int_to_ptr.hbm [resolvable:$true] %s967_s26 }
  0x3a   : > { %369 = vmatpush.bf16.msra.mxu0 %v759_v1  ;;  %771 = vmatpush.bf16.msra.mxu2 %v759_v1  ;;  %v296_v13 = vpack.c.bf16 %v1185_v11, %v1182_v10  ;;  %v1195_v15 = vld [vmem:[%s1165_s13 + $0x18] sm:$0xff]  ;;  %v1201_v17 = vld [vmem:[%s1165_s13 + $0x48] sm:$0xff]  ;;  %v1208_v23 = vld [vmem:[%s1165_s13 + $0x20] sm:$0xff]  ;;  %s969_s27 = scalar_lea.hbm %s968_s26, 104  ;;  %p974_p11 = scmp.lt.s32.totalorder %s968_s26, %s1303_s5 }
  0x3b   : > { %v294_v18 = vpack.c.bf16 %v1195_v15, %v1192_v14  ;;  %v297_v19 = vpack.c.bf16 %v1201_v17, %v1198_v16  ;;  %v768_v20 = vld [vmem:[#allocation7 + $0x38] sm:$0xff]  ;;  %v767_v21 = vld [vmem:[#allocation7 + $0x30] sm:$0xff]  ;;  %v766_v22 = vld [vmem:[#allocation7 + $0x28] sm:$0xff]  ;;  %p970_p1 = scmp.ne.s32.totalorder %s968_s26, %s969_s27 }
  0x3c   : > { %499 = vmatpush.bf16.msra.mxu1 %v768_v20  ;;  %778 = vmatpush.bf16.msra.mxu3 %v768_v20  ;;  %v1211_v24 = vld [vmem:[%s1165_s13 + $0x28] sm:$0xff]  ;;  %v1214_v25 = vld [vmem:[%s1165_s13 + $0x50] sm:$0xff]  ;;  %v1217_v26 = vld [vmem:[%s1165_s13 + $0x58] sm:$0xff] }
  0x3d   : > { %v765_v27 = vld [vmem:[#allocation7 + $0x20] sm:$0xff]  ;;  %v295_v28 = vpack.c.bf16 %v1211_v24, %v1208_v23  ;;  %v298_v29 = vpack.c.bf16 %v1217_v26, %v1214_v25  ;;  %v1224_v30 = vld [vmem:[%s1165_s13 + $0x60] sm:$0xff]  ;;  %v762_v34 = vld [vmem:[#allocation7 + $0x8] sm:$0xff]  ;;  %p971_p4 = pnand %p970_p1, %p1129_p3  ;;  %s973_s13 = scalar_lea.hbm %s1303_s5, 208 }
  0x3e   : > { %370 = vmatpush.bf16.msra.mxu0 %v758_v2  ;;  %772 = vmatpush.bf16.msra.mxu2 %v758_v2  ;;  %v299_v31 = vpack.c.bf16 %v1224_v30, %v1224_v30  ;;  %v764_v32 = vld [vmem:[#allocation7 + $0x18] sm:$0xff]  ;;  %v763_v33 = vld [vmem:[#allocation7 + $0x10] sm:$0xff]  ;;  %v761_v35 = vld [vmem:[#allocation7] sm:$0xff]  ;;  %p975_p9 = scmp.lt.s32.totalorder %s973_s13, %s969_s27 }
  0x3f   : > { %v861_v37 = vld [vmem:[%s1300_s2] ss:$0 sm:$0xff]  ;;  %p972_p8 = pneg %p971_p4 }
  0x40   : > { %500 = vmatpush.bf16.msra.mxu1 %v767_v21  ;;  %779 = vmatpush.bf16.msra.mxu3 %v767_v21  ;;  %p976_p2 = por %p975_p9, %p974_p11 }
  0x42   : > { %371 = vmatpush.bf16.msra.mxu0 %v757_v3  ;;  %773 = vmatpush.bf16.msra.mxu2 %v757_v3  ;;  %p977_p10 = pnand %p976_p2, %p972_p8 }
  0x44   : > { %501 = vmatpush.bf16.msra.mxu1 %v766_v22  ;;  %780 = vmatpush.bf16.msra.mxu3 %v766_v22 }
  0x46   : > { %372 = vmatpush.bf16.msra.mxu0 %v756_v4  ;;  %774 = vmatpush.bf16.msra.mxu2 %v756_v4 }
  0x48   : > { %502 = vmatpush.bf16.msra.mxu1 %v765_v27  ;;  %781 = vmatpush.bf16.msra.mxu3 %v765_v27 }
  0x4a   : > { %373 = vmatpush.bf16.msra.mxu0 %v755_v5  ;;  %775 = vmatpush.bf16.msra.mxu2 %v755_v5 }
  0x4c   : > { %503 = vmatpush.bf16.msra.mxu1 %v764_v32  ;;  %782 = vmatpush.bf16.msra.mxu3 %v764_v32 }
  0x4e   : > { %374 = vmatpush.bf16.msra.mxu0 %v754_v6  ;;  %776 = vmatpush.bf16.msra.mxu2 %v754_v6 }
  0x50   : > { %504 = vmatpush.bf16.msra.mxu1 %v763_v33  ;;  %783 = vmatpush.bf16.msra.mxu3 %v763_v33  ;;  %v862_v33 = vld [vmem:[%s1302_s4] ss:$0 sm:$0xff] }
  0x52   : > { %375 = vmatpush.bf16.msra.mxu0 %v753_v7  ;;  %777 = vmatpush.bf16.msra.mxu2 %v753_v7 }
  0x54   : > { %505 = vmatpush.bf16.msra.mxu1 %v762_v34  ;;  %784 = vmatpush.bf16.msra.mxu3 %v762_v34 }
  0x55   : > { %376 = vmatmul.bf16.vlgmr.msra.gmra.mxu0 %v293_v12  ;;  %391 = vmatmul.bf16.vlgmr.msra.gmra.mxu2 %v296_v13 }
  0x58   : > { %506 = vmatpush.bf16.msra.mxu1 %v761_v35  ;;  %785 = vmatpush.bf16.msra.mxu3 %v761_v35 }
  0x65   : > { %381 = vmatmul.bf16.gmra.mxu0 %v294_v18  ;;  %396 = vmatmul.bf16.gmra.mxu2 %v297_v19 }
  0x75   : > { %386 = vmatmul.bf16.gmra.mxu0 %v295_v28  ;;  %401 = vmatmul.bf16.gmra.mxu2 %v298_v29 }
  0x85   : > { %406 = vmatmul.bf16.gmra.mxu2 %v299_v31 }
  0xd2   : > { %v377_v36 = vpop.f32.mrf.mxu0 }
  0xd3   : > { %v378_v39 = vadd.f32 %v861_v37, %v377_v36 }
  0xd5   : > { %v411_v42 = vmax.f32 %v378_v39, 0.0 }
  0xd8   : > { %v392_v38 = vpop.f32.mrf.mxu2 }
  0xd9   : > { %v393_v20 = vadd.f32 %v861_v37, %v392_v38 }
  0xda   : > { %v379_v40 = vpop.f32.mrf.mxu0 }
  0xdb   : > { %v380_v41 = vadd.f32 %v861_v37, %v379_v40  ;;  %v417_v27 = vmax.f32 %v393_v20, 0.0 }
  0xdd   : > { %v412_v43 = vmax.f32 %v380_v41, 0.0 }
  0xdf   : > { %v424_v44 = vpack.c.bf16 %v412_v43, %v411_v42 }
  0xe0   : > { %v394_v45 = vpop.f32.mrf.mxu2 }
  0xe1   : > { %507 = vmatmul.bf16.vlgmr.msra.gmra.mxu1 %v424_v44  ;;  %v395_v18 = vadd.f32 %v861_v37, %v394_v45 }
  0xe2   : > { %v382_v46 = vpop.f32.mrf.mxu0 }
  0xe3   : > { %v383_v48 = vadd.f32 %v861_v37, %v382_v46  ;;  %v418_v21 = vmax.f32 %v395_v18, 0.0 }
  0xe5   : > { %v413_v51 = vmax.f32 %v383_v48, 0.0  ;;  %v427_v29 = vpack.c.bf16 %v418_v21, %v417_v27 }
  0xe8   : > { %v397_v47 = vpop.f32.mrf.mxu2 }
  0xe9   : > { %v398_v53 = vadd.f32 %v861_v37, %v397_v47 }
  0xea   : > { %v384_v49 = vpop.f32.mrf.mxu0 }
  0xeb   : > { %v385_v50 = vadd.f32 %v861_v37, %v384_v49  ;;  %v419_v58 = vmax.f32 %v398_v53, 0.0 }
  0xed   : > { %v414_v52 = vmax.f32 %v385_v50, 0.0 }
  0xef   : > { %v425_v54 = vpack.c.bf16 %v414_v52, %v413_v51 }
  0xf0   : > { %v399_v55 = vpop.f32.mrf.mxu2 }
  0xf1   : > { %v400_v56 = vadd.f32 %v861_v37, %v399_v55  ;;  %512 = vmatmul.bf16.gmra.mxu1 %v425_v54 }
  0xf2   : > { %v387_v57 = vpop.f32.mrf.mxu0 }
  0xf3   : > { %v420_v59 = vmax.f32 %v400_v56, 0.0  ;;  %v388_v62 = vadd.f32 %v861_v37, %v387_v57 }
  0xf5   : > { %v428_v60 = vpack.c.bf16 %v420_v59, %v419_v58  ;;  %v415_v1 = vmax.f32 %v388_v62, 0.0 }
  0xf7   : > { %527 = vmatmul.bf16.vlgmr.msra.gmra.mxu3 %v428_v60 }
  0xf8   : > { %v402_v61 = vpop.f32.mrf.mxu2 }
  0xf9   : > { %v403_v3 = vadd.f32 %v861_v37, %v402_v61 }
  0xfa   : > { %v389_v63 = vpop.f32.mrf.mxu0 }
  0xfb   : > { %v390_v0 = vadd.f32 %v861_v37, %v389_v63  ;;  %v421_v7 = vmax.f32 %v403_v3, 0.0 }
  0xfd   : > { %v416_v2 = vmax.f32 %v390_v0, 0.0 }
  0xff   : > { %v426_v4 = vpack.c.bf16 %v416_v2, %v415_v1 }
 0x100   : > { %v404_v5 = vpop.f32.mrf.mxu2 }
 0x101   : > { %v405_v6 = vadd.f32 %v861_v37, %v404_v5  ;;  %517 = vmatmul.bf16.gmra.mxu1 %v426_v4 }
 0x103   : > { %v422_v12 = vmax.f32 %v405_v6, 0.0 }
 0x105   : > { %v429_v13 = vpack.c.bf16 %v422_v12, %v421_v7 }
 0x107   : > { %532 = vmatmul.bf16.gmra.mxu3 %v429_v13 }
 0x108   : > { %v407_v19 = vpop.f32.mrf.mxu2 }
 0x109   : > { %v408_v22 = vadd.f32 %v861_v37, %v407_v19 }
 0x10b   : > { %v423_v28 = vmax.f32 %v408_v22, 0.0 }
 0x10d   : > { %v430_v32 = vpack.c.bf16 %v423_v28, %v423_v28 }
 0x110   : > { %v409_v31 = vpop.f32.mrf.mxu2 }
 0x111   : > { %522 = vmatmul.bf16.gmra.mxu1 %v427_v29 }
 0x117   : > { %537 = vmatmul.bf16.gmra.mxu3 %v430_v32 }
 0x15e   : > { %v508_v34 = vpop.f32.mrf.mxu1 }
 0x15f   : > { %v509_v35 = vadd.f32 %v862_v33, %v508_v34 }
 0x161   : > { %v542_v36 = vadd.f32 %v509_v35, %v1176_v8 }
 0x163   : > { %555 = vst [vmem:[%s1237_s11] sm:$0xff] %v542_v36 }
 0x166   : > { %v510_v37 = vpop.f32.mrf.mxu1 }
 0x167   : > { %v511_v38 = vadd.f32 %v862_v33, %v510_v37 }
 0x169   : > { %v543_v39 = vadd.f32 %v511_v38, %v1179_v9 }
 0x16b   : > { %556 = vst [vmem:[%s1237_s11 + $0x8] sm:$0xff] %v543_v39 }
 0x16e   : > { %v513_v40 = vpop.f32.mrf.mxu1 }
 0x16f   : > { %v514_v41 = vadd.f32 %v862_v33, %v513_v40 }
 0x171   : > { %v544_v42 = vadd.f32 %v514_v41, %v1192_v14 }
 0x173   : > { %557 = vst [vmem:[%s1237_s11 + $0x10] sm:$0xff] %v544_v42 }
 0x176   : > { %v515_v8 = vpop.f32.mrf.mxu1 }
 0x177   : > { %v516_v43 = vadd.f32 %v862_v33, %v515_v8 }
 0x179   : > { %v545_v44 = vadd.f32 %v516_v43, %v1195_v15 }
 0x17a   : > { %v528_v45 = vpop.f32.mrf.mxu3 }
 0x17b   : > { %558 = vst [vmem:[%s1237_s11 + $0x18] sm:$0xff] %v545_v44  ;;  %v529_v46 = vadd.f32 %v862_v33, %v528_v45 }
 0x17d   : > { %v550_v47 = vadd.f32 %v529_v46, %v1198_v16 }
 0x17e   : > { %v518_v48 = vpop.f32.mrf.mxu1 }
 0x17f   : > { %563 = vst [vmem:[%s1237_s11 + $0x40] sm:$0xff] %v550_v47  ;;  %v519_v9 = vadd.f32 %v862_v33, %v518_v48 }
 0x181   : > { %v546_v49 = vadd.f32 %v519_v9, %v1208_v23 }
 0x182   : > { %v530_v50 = vpop.f32.mrf.mxu3 }
 0x183   : > { %559 = vst [vmem:[%s1237_s11 + $0x20] sm:$0xff] %v546_v49  ;;  %v531_v14 = vadd.f32 %v862_v33, %v530_v50 }
 0x185   : > { %v551_v51 = vadd.f32 %v531_v14, %v1201_v17 }
 0x186   : > { %v520_v15 = vpop.f32.mrf.mxu1 }
 0x187   : > { %564 = vst [vmem:[%s1237_s11 + $0x48] sm:$0xff] %v551_v51  ;;  %v521_v52 = vadd.f32 %v862_v33, %v520_v15 }
 0x189   : > { %v547_v53 = vadd.f32 %v521_v52, %v1211_v24 }
 0x18a   : > { %v533_v16 = vpop.f32.mrf.mxu3 }
 0x18b   : > { %560 = vst [vmem:[%s1237_s11 + $0x28] sm:$0xff] %v547_v53  ;;  %v534_v54 = vadd.f32 %v862_v33, %v533_v16 }
 0x18d   : > { %v552_v55 = vadd.f32 %v534_v54, %v1214_v25 }
 0x18e   : > { %v523_v23 = vpop.f32.mrf.mxu1 }
 0x18f   : > { %565 = vst [vmem:[%s1237_s11 + $0x50] sm:$0xff] %v552_v55  ;;  %v524_v56 = vadd.f32 %v862_v33, %v523_v23 }
 0x191   : > { %v548_v57 = vadd.f32 %v524_v56, %v1182_v10 }
 0x192   : > { %v535_v58 = vpop.f32.mrf.mxu3 }
 0x193   : > { %561 = vst [vmem:[%s1237_s11 + $0x30] sm:$0xff] %v548_v57  ;;  %v536_v17 = vadd.f32 %v862_v33, %v535_v58 }
 0x195   : > { %v553_v24 = vadd.f32 %v536_v17, %v1217_v26 }
 0x196   : > { %v525_v59 = vpop.f32.mrf.mxu1 }
 0x197   : > { %566 = vst [vmem:[%s1237_s11 + $0x58] sm:$0xff] %v553_v24  ;;  %v526_v25 = vadd.f32 %v862_v33, %v525_v59 }
 0x199   : > { %v549_v60 = vadd.f32 %v526_v25, %v1185_v11 }
 0x19a   : > { %v538_v10 = vpop.f32.mrf.mxu3 }
 0x19b   : > { %562 = vst [vmem:[%s1237_s11 + $0x38] sm:$0xff] %v549_v60  ;;  %v539_v61 = vadd.f32 %v862_v33, %v538_v10 }
 0x19d   : > { %v554_v62 = vadd.f32 %v539_v61, %v1224_v30 }
 0x19f   : > { %567 = vst [vmem:[%s1237_s11 + $0x60] sm:$0xff] %v554_v62 }
 0x1a0   : > { %980 = shalt.err (!%p977_p10)
}
 0x1a1   : > { %s1031_s1 = smov 128   ;;  %s1032_s30 = smov 8  }
 0x1a2   : > { %798 = dma.vmem_to_hbm [thread:$0]  (%p1129_p3), %s582_s7, 1664, %s584_s28, %s569_s22, %s1031_s1, %s1031_s1, %s1032_s30   ;;  %v540_v11 = vpop.f32.mrf.mxu3 }
 0x1a3 PF: > { %s598_s10 = sand.u32 1, %s1011_s18   ;;  %p1311_p12 = scmp.ge.s32.totalorder %s1023_s21, 2 }
 0x1a4   : > { %s599_s11 = scalar_lea.sflag [#allocation4], %s598_s10 }
 0x1a5   : > { %p812_p13 = pnand %p1311_p12, %p1098_p6 }
 0x1a7   : > { %p813_p0 = pneg %p812_p13 }
 0x1a9   : > { %1006 = dma.done.wait (%p813_p0), %s599_s11, 1664  }
 0x1aa   : > { %1008 = vsyncadd (%p813_p0), %s599_s11, 4294965632  ;;  %p19_p5 = scmp.ge.s32.totalorder %s1119_s14, 4   ;;  %s1312_s18 = smov %s1015_s19 }
 0x1ab   : > { %s1313_s19 = smov %s1019_s20  ;;  %s1314_s20 = smov %s1135_s23 }
 0x1ac   : > { %s1315_s21 = smov %s1119_s14  ;;  %21 = sbr.rel (!%p19_p5) target bundleno = 8 (0x8), region = 93 }
 0x1b1   :  { %605 = vsyncpa [#allocation3], 1 }
 0x1b2   :  { %607 = vsyncpa [#allocation3 + $0x1], 1 }
 0x1b3   :  { %608 = vsyncpa [#allocation6], 1 }
 0x1b4   :  { %609 = vsyncpa [#allocation4], 1 }
 0x1b5   :  { %611 = vsyncpa [#allocation4 + $0x1], 1 }

</bundles_post_ra>
